<compile_context>
chip_gen: v7x
topology: tpu7x:2x2x1
jax: 0.10.0
libtpu: 0.0.40
codegen_flags: <defaults>
</compile_context>

<pallas_src>
import math
import numpy as np
import jax
import jax.numpy as jnp
from jax import lax
from jax.experimental import pallas as pl
from jax.experimental.pallas import tpu as pltpu


def _cdiv(a, b):
    return -(-a // b)


def _round_up(a, b):
    return _cdiv(a, b) * b


# --------------------- generation-aware VMEM budgets (v5e/v6e vs v7x) ---------------------

def _vmem_capacity_bytes():
    try:
        info = pltpu.get_tpu_info()
        for attr in ("vmem_capacity_bytes", "vmem_bytes", "vmem_size_bytes"):
            v = getattr(info, attr, None)
            if v:
                return int(v)
    except Exception:
        pass
    return 64 * 1024 * 1024            # conservative default (v7x-sized VMEM)


_VMEM_CAP = _vmem_capacity_bytes()
if _VMEM_CAP >= 96 * 1024 * 1024:      # v5e / v6e: 128 MiB physical VMEM
    _BLOCK_BUDGET = 12 * 1024 * 1024
    _VMEM_LIMIT = 80 * 1024 * 1024
else:                                  # v7x: 64 MiB physical VMEM
    _BLOCK_BUDGET = 5 * 1024 * 1024
    _VMEM_LIMIT = 44 * 1024 * 1024


# ----------------------------- host-side setup (numpy) -----------------------------

def _wigner_d(l, mp, m, beta):
    """Wigner small-d element d^l_{mp,m}(beta), quantum / Condon-Shortley convention."""
    pref = math.sqrt(math.factorial(l + mp) * math.factorial(l - mp)
                     * math.factorial(l + m) * math.factorial(l - m))
    c = math.cos(beta / 2.0)
    s = math.sin(beta / 2.0)
    k_min = max(0, m - mp)
    k_max = min(l + m, l - mp)
    tot = 0.0
    for k in range(k_min, k_max + 1):
        den = (math.factorial(l + m - k) * math.factorial(k)
               * math.factorial(mp - m + k) * math.factorial(l - mp - k))
        tot += ((-1.0) ** (mp - m + k) / den
                * c ** (2 * l - mp + m - 2 * k) * s ** (mp - m + 2 * k))
    return pref * tot


def _s3_quadrature_weights(b):
    """SOFT quadrature weights over beta for bandwidth b (lie_learn S3 convention)."""
    k = np.arange(b)
    w = np.array([(2.0 / b) * np.sin(np.pi * (2 * j + 1) / (4.0 * b))
                  * np.sum(np.sin((2 * j + 1) * (2 * k + 1) * np.pi / (4.0 * b)) / (2 * k + 1))
                  for j in range(2 * b)])
    return w / (2.0 * (2 * b) ** 2)


def _build_beta_resampling_full(b_in, b_out):
    """K[f, beta_out, beta_in] for the FULL (2*b_out)^2 frequency plane.

    Frequencies follow FFT-bin order m = 0..b_out-1, -b_out..-1 per axis; for
    |m| == b_out or |n| == b_out (the Nyquist bins) no l < b_out contributes and the
    corresponding K slices are identically zero, which yields the required zero
    output bins without any post-hoc zero insertion.
    K_{mn} = sum_l (2l+1) d^l_mn(beta_o) (x) w d^l_mn(beta_i).
    """
    two_bi, two_bo = 2 * b_in, 2 * b_out
    betas_in = (np.arange(two_bi) + 0.5) * np.pi / two_bi
    betas_out = (np.arange(two_bo) + 0.5) * np.pi / two_bo
    w = _s3_quadrature_weights(b_in)
    ms = list(range(0, b_out)) + list(range(-b_out, 0))
    nfr = len(ms)                                       # 2*b_out
    K = np.zeros((nfr, nfr, two_bo, two_bi), dtype=np.float64)
    for i, m in enumerate(ms):
        for j, n in enumerate(ms):
            for l in range(max(abs(m), abs(n)), b_out):
                d_o = np.array([_wigner_d(l, m, n, b) for b in betas_out])
                d_i = np.array([_wigner_d(l, m, n, b) for b in betas_in])
                K[i, j] += (2 * l + 1) * np.outer(d_o, d_i * w)
    return K.reshape(nfr * nfr, two_bo, two_bi).astype(np.float32)


# --------------------------------- Pallas kernels ----------------------------------

def _select_fb(F, O_pad, P_pad, C_in, C_out):
    """Frequencies per grid step: MXU-shaped (~256 rows) but inside the VMEM block budget."""
    fb_target = max(1, _cdiv(256, min(O_pad, P_pad)))
    fb = min(F, fb_target, 64)

    def fits(f):
        b = 4 * (2 * f * O_pad * P_pad           # compact K block, double-buffered
                 + 2 * f * P_pad * C_in          # X block, double-buffered
                 + 2 * f * O_pad * C_out         # out block, double-buffered
                 + f * f * O_pad * P_pad         # block-diagonal K scratch
                 + f * max(P_pad * C_out, O_pad * C_in)   # in-kernel intermediate
                 + 2 * C_in * C_out)             # resident W
        return b <= _BLOCK_BUDGET

    while fb > 1 and not fits(fb):
        fb -= 1
    # give the (parallel) grid at least 2 steps so v7x's two TensorCores both work
    if fb >= F and F > 1:
        fb = _cdiv(F, 2)
    return max(1, fb)


def _so3_spectral_mix(K, Xs, W_bd, premix):
    """Fused per-frequency beta resampling + feature mix.

    K:    [F, O_pad, P_pad]   compact beta-resampling operators (one per frequency)
    Xs:   [F, P_pad, C_in]    frequency-major spectral input, lanes = (B, re/im, f) padded to 128
    W_bd: [C_in, C_out]       block-diagonal kron(I_{B*2}, scaling*W), zero-padded
    returns [F, O_pad, C_out]

    Per grid step the Fb compact K slices are assembled into a block-diagonal
    [Fb*O_pad, Fb*P_pad] operator in VMEM, so the whole step is two MXU-shaped
    matmuls and one wide lane-dense store; HBM traffic for K stays compact.
    """
    F, O_pad, P_pad = K.shape
    C_in = Xs.shape[2]
    C_out = W_bd.shape[1]
    Fb = _select_fb(F, O_pad, P_pad, C_in, C_out)
    F_pad = _round_up(F, Fb)
    Nblk = F_pad // Fb
    if F_pad != F:
        K = jnp.pad(K, ((0, F_pad - F), (0, 0), (0, 0)))
        Xs = jnp.pad(Xs, ((0, F_pad - F), (0, 0), (0, 0)))

    Kb = K.reshape(Nblk, Fb, O_pad, P_pad)            # contiguous reshape
    Xb = Xs.reshape(Nblk, Fb * P_pad, C_in)           # contiguous reshape (no relayout)

    def kernel(k_ref, x_ref, w_ref, o_ref, kbd_ref):
        # Assemble the block-diagonal K in VMEM.  Zeroed every step (cheap: a few
        # dozen vector stores) so the off-diagonal is always valid even when the
        # parallel grid axis is split across TensorCores.
        kbd_ref[...] = jnp.zeros_like(kbd_ref)
        for j in range(Fb):
            kbd_ref[j * O_pad:(j + 1) * O_pad,
                    j * P_pad:(j + 1) * P_pad] = k_ref[0, j]
        kbd = kbd_ref[...]
        x = x_ref[0]
        w = w_ref[...]
        if premix:
            y = jnp.dot(x, w, preferred_element_type=jnp.float32)        # [Fb*P_pad, C_out]
            o_ref[0] = jnp.dot(kbd, y, preferred_element_type=jnp.float32)
        else:
            y = jnp.dot(kbd, x, preferred_element_type=jnp.float32)      # [Fb*O_pad, C_in]
            o_ref[0] = jnp.dot(y, w, preferred_element_type=jnp.float32)

    Zb = pl.pallas_call(
        kernel,
        out_shape=jax.ShapeDtypeStruct((Nblk, Fb * O_pad, C_out), jnp.float32),
        grid=(Nblk,),
        in_specs=[pl.BlockSpec((1, Fb, O_pad, P_pad), lambda g: (g, 0, 0, 0)),
                  pl.BlockSpec((1, Fb * P_pad, C_in), lambda g: (g, 0, 0)),
                  pl.BlockSpec((C_in, C_out), lambda g: (0, 0))],
        out_specs=pl.BlockSpec((1, Fb * O_pad, C_out), lambda g: (g, 0, 0)),
        scratch_shapes=[pltpu.VMEM((Fb * O_pad, Fb * P_pad), jnp.float32)],
        compiler_params=pltpu.CompilerParams(
            dimension_semantics=("parallel",),
            vmem_limit_bytes=_VMEM_LIMIT),
    )(Kb, Xb, W_bd)

    Z = Zb.reshape(F_pad, O_pad, C_out)               # contiguous reshape
    return Z[:F]


def _choose_spatial_tile(S_total, unit_bytes, budget=_BLOCK_BUDGET):
    """Largest multiple-of-128 divisor of S_total whose block fits the budget (>=128)."""
    best = 128
    t = 128
    while t <= S_total:
        if S_total % t == 0 and t * unit_bytes <= budget:
            best = t
        t += 128
    return best


def _batchnorm3d(z3, gamma, beta, eps):
    """Training-mode BatchNorm3d on z3: [B, C, S] native layout (no transposes).

    Pass 1: per-channel sum / sumsq, two parallel spatial halves (v7x: both TCs busy),
            accumulated across an "arbitrary" inner spatial axis.
    Pass 2: affine normalization, output aliased onto the input buffer.

    The spatial extent is zero-padded to a multiple of 256 host-side (stats-neutral,
    the count n keeps the true extent) so blocks are always lane-dense 128..512 tiles.
    """
    B, C, S = z3.shape
    n_true = float(B * S)
    S_pad = _round_up(max(S, 256), 256)
    if S_pad != S:
        z3 = jnp.pad(z3, ((0, 0), (0, 0), (0, S_pad - S)))

    NP = 2
    S_half = S_pad // NP
    S_ts = _choose_spatial_tile(S_half, 2 * B * C * 4)
    nSi = S_half // S_ts

    def stats_kernel(x_ref, sum_ref, ssq_ref):
        @pl.when(pl.program_id(1) == 0)
        def _():
            sum_ref[...] = jnp.zeros_like(sum_ref)
            ssq_ref[...] = jnp.zeros_like(ssq_ref)

        x = x_ref[...]                                          # [B, C, S_ts]
        sum_ref[...] += jnp.sum(x, axis=(0, 2))[None, :, None]
        ssq_ref[...] += jnp.sum(x * x, axis=(0, 2))[None, :, None]

    psum, pssq = pl.pallas_call(
        stats_kernel,
        out_shape=(jax.ShapeDtypeStruct((NP, C, 1), jnp.float32),
                   jax.ShapeDtypeStruct((NP, C, 1), jnp.float32)),
        grid=(NP, nSi),
        in_specs=[pl.BlockSpec((B, C, S_ts), lambda p, s: (0, 0, p * nSi + s))],
        out_specs=(pl.BlockSpec((1, C, 1), lambda p, s: (p, 0, 0)),
                   pl.BlockSpec((1, C, 1), lambda p, s: (p, 0, 0))),
        compiler_params=pltpu.CompilerParams(
            dimension_semantics=("parallel", "arbitrary"),
            vmem_limit_bytes=_VMEM_LIMIT),
    )(z3)

    S_tn = _choose_spatial_tile(S_pad, 4 * B * C * 4)
    nS = S_pad // S_tn
    inv_n = 1.0 / n_true

    def norm_kernel(x_ref, ps_ref, pq_ref, g_ref, b_ref, o_ref):
        tot = jnp.sum(ps_ref[...], axis=0)                      # [C, 1]
        totq = jnp.sum(pq_ref[...], axis=0)
        mean = tot * inv_n
        # NOTE: biased E[x^2]-E[x]^2 variance (matches PyTorch training BN); f32 accum.
        var = totq * inv_n - mean * mean
        inv = lax.rsqrt(jnp.maximum(var, 0.0) + eps)
        scale = g_ref[...] * inv
        shift = b_ref[...] - mean * scale
        o_ref[...] = x_ref[...] * scale[None] + shift[None]

    out = pl.pallas_call(
        norm_kernel,
        out_shape=jax.ShapeDtypeStruct((B, C, S_pad), jnp.float32),
        grid=(nS,),
        in_specs=[pl.BlockSpec((B, C, S_tn), lambda s: (0, 0, s)),
                  pl.BlockSpec((NP, C, 1), lambda s: (0, 0, 0)),
                  pl.BlockSpec((NP, C, 1), lambda s: (0, 0, 0)),
                  pl.BlockSpec((C, 1), lambda s: (0, 0)),
                  pl.BlockSpec((C, 1), lambda s: (0, 0))],
        out_specs=pl.BlockSpec((B, C, S_tn), lambda s: (0, 0, s)),
        input_output_aliases={0: 0},
        compiler_params=pltpu.CompilerParams(
            dimension_semantics=("parallel",),
            vmem_limit_bytes=_VMEM_LIMIT),
    )(z3, psum, pssq, gamma.reshape(C, 1), beta.reshape(C, 1))
    return out[:, :, :S]


# ------------------------------------ module ---------------------------------------

class SO3ShortcutPallas:
    """Pallas/JAX port of SO3Shortcut."""

    def __init__(self, f_in, f_out, b_in, b_out, key):
        assert b_out <= b_in
        self.f_in, self.f_out, self.b_in, self.b_out = f_in, f_out, b_in, b_out
        self.has_conv = (f_in != f_out) or (b_in != b_out)
        if not self.has_conv:
            return
        # SO3Convolution parameters (grid = ((0,0,0),)  ->  len(grid) == 1)
        self.kernel = jax.random.uniform(key, (f_in, f_out, 1), jnp.float32, -1.0, 1.0)
        self.scaling = 1.0 / math.sqrt(1 * f_in * (b_out ** 3) / (b_in ** 3))
        # Conv bias (init zeros).  Under training-mode BatchNorm a per-channel bias is
        # exactly cancelled by the mean subtraction, so it is folded away (never added).
        # BatchNorm3d parameters (fresh init; forward uses batch statistics = training mode)
        self.bn_gamma = jnp.ones((f_out,), jnp.float32)
        self.bn_beta = jnp.zeros((f_out,), jnp.float32)
        self.bn_eps = 1e-5
        # full-frequency-plane beta-resampling operator (Nyquist slices are zero),
        # padded host-side so the beta dims are sublane multiples of 8
        O, P = 2 * b_out, 2 * b_in
        self.O_pad = _round_up(O, 8)
        self.P_pad = _round_up(P, 8)
        Kf = _build_beta_resampling_full(b_in, b_out)               # [(2*b_out)^2, O, P]
        Kf = np.pad(Kf, ((0, 0), (0, self.O_pad - O), (0, self.P_pad - P)))
        self.K = jnp.asarray(Kf)                                    # [F, O_pad, P_pad]

    def __call__(self, x):
        # x: [batch, f_in, 2*b_in, 2*b_in, 2*b_in]
        if not self.has_conv:
            return x
        B = x.shape[0]
        bi2, bo2 = 2 * self.b_in, 2 * self.b_out
        nfr = 2 * self.b_out                     # full frequency grid per axis (FFT-bin order)
        F = nfr * nfr
        assert x.shape == (B, self.f_in, bi2, bi2, bi2)

        # forward SO(3) FFT, part 1: DFT over (alpha, gamma)
        X1 = jnp.fft.fft2(x.astype(jnp.float32), axes=(-2, -1))        # complex64

        # keep the 2*b_out bins per axis via two contiguous slices; the concatenated
        # order matches output FFT-bin order (the Nyquist bins hit zero rows of K).
        Xa = jnp.concatenate([X1[..., :self.b_out, :],
                              X1[..., bi2 - self.b_out:, :]], axis=-2)
        Xg = jnp.concatenate([Xa[..., :self.b_out],
                              Xa[..., bi2 - self.b_out:]], axis=-1)
        # [B, f_in, beta_in, mu, nu]

        # frequency-major, real/imag-split layout; lanes ordered (batch, re/im, feature)
        Xt = jnp.transpose(Xg, (3, 4, 2, 0, 1))                        # [mu, nu, beta_in, B, f_in]
        Xs = jnp.stack([Xt.real, Xt.imag], axis=4)                     # [mu, nu, beta_in, B, 2, f_in]

        G = B * 2
        Cin_raw, Cout_raw = G * self.f_in, G * self.f_out
        C_in = _round_up(Cin_raw, 128)
        C_out = _round_up(Cout_raw, 128)

        Xs = Xs.reshape(F, bi2, Cin_raw).astype(jnp.float32)
        Xs = jnp.pad(Xs, ((0, 0), (0, self.P_pad - bi2), (0, C_in - Cin_raw)))

        # block-diagonal feature-mix operator over the folded (batch, re/im) lane groups
        W_eff = (self.kernel[:, :, 0] * self.scaling).astype(jnp.float32)   # [f_in, f_out]
        W_bd = jnp.kron(jnp.eye(G, dtype=jnp.float32), W_eff)               # [G*f_in, G*f_out]
        W_bd = jnp.pad(W_bd, ((0, C_in - Cin_raw), (0, C_out - Cout_raw)))

        # fused beta resampling + feature mix (mix before K when it shrinks the lanes)
        premix = C_out < C_in
        Z = _so3_spectral_mix(self.K, Xs, W_bd, premix)                # [F, O_pad, C_out]

        # back to complex, already in FFT-bin order (no Nyquist re-insertion needed)
        Z = Z[:, :bo2, :Cout_raw].reshape(nfr, nfr, bo2, B, 2, self.f_out)
        Zc = lax.complex(Z[..., 0, :], Z[..., 1, :])                   # [mu, nu, beta_out, B, f_out]
        Zc = jnp.transpose(Zc, (3, 4, 2, 0, 1))                        # [B, f_out, beta_out, mu, nu]

        # inverse DFT over (alpha, gamma); the (2*b_out)^2 un-normalization is folded
        # into the BatchNorm eps below (training-mode BN is scale invariant up to eps).
        z = jnp.real(jnp.fft.ifft2(Zc, axes=(-2, -1))).astype(jnp.float32)

        # BatchNorm3d on the native [B, C, D*H*W] layout
        z3 = z.reshape(B, self.f_out, bo2 * bo2 * bo2)
        eps_eff = self.bn_eps / float(bo2 ** 4)
        out = _batchnorm3d(z3, self.bn_gamma, self.bn_beta, eps_eff)
        return out.reshape(B, self.f_out, bo2, bo2, bo2)


if __name__ == "__main__":
    key = jax.random.PRNGKey(0)
    k_x, k_p = jax.random.split(key)

    batch, f_in, f_out, b_in, b_out = 2, 4, 8, 4, 2
    x = jax.random.normal(k_x, (batch, f_in, 2 * b_in, 2 * b_in, 2 * b_in), dtype=jnp.float32)

    module = SO3ShortcutPallas(f_in, f_out, b_in, b_out, key=k_p)
    y = jax.block_until_ready(module(x))

    assert y.shape == (batch, f_out, 2 * b_out, 2 * b_out, 2 * b_out), y.shape
    assert bool(jnp.all(jnp.isfinite(y)))
    print("KERNEL_OK")
</pallas_src>

<mosaic_0001>
module attributes {stable_mosaic.version = 11 : i64} {
  func.func @kernel(%arg0: i32, %arg1: memref<1x8x8x8xf32, #tpu.memory_space<vmem>>, %arg2: memref<1x64x128xf32, #tpu.memory_space<vmem>>, %arg3: memref<128x128xf32, #tpu.memory_space<vmem>>, %arg4: memref<1x64x128xf32, #tpu.memory_space<vmem>>, %arg5: memref<64x64xf32, #tpu.memory_space<vmem>>) attributes {dimension_semantics = [#tpu.dimension_semantics<parallel>], iteration_bounds = array<i64: 2>, scalar_prefetch = 0 : i64, scratch_operands = 1 : i64, tpu.core_type = #tpu.core_type<tc>, window_params = [{transform_indices = @transform_0, window_bounds = array<i64: 1, 8, 8, 8>}, {transform_indices = @transform_1, window_bounds = array<i64: 1, 64, 128>}, {pipeline_mode = #tpu.pipeline_mode<synchronous>, transform_indices = @transform_2, window_bounds = array<i64: 128, 128>}, {transform_indices = @transform_3, window_bounds = array<i64: 1, 64, 128>}]} {
    %cst = arith.constant 0.000000e+00 : f32
    %0 = vector.broadcast %cst : f32 to vector<64x64xf32>
    %c0 = arith.constant 0 : index
    %c0_0 = arith.constant 0 : index
    %1 = vector.load %arg5[%c0, %c0_0] : memref<64x64xf32, #tpu.memory_space<vmem>>, vector<64x64xf32>
    tpu.vector_store %arg5[%c0, %c0_0], %0 {strides = array<i32>} : memref<64x64xf32, #tpu.memory_space<vmem>>, vector<64x64xf32>,
    %c0_1 = arith.constant 0 : index
    %c0_2 = arith.constant 0 : index
    %c0_3 = arith.constant 0 : index
    %c0_4 = arith.constant 0 : index
    %2 = vector.load %arg1[%c0_1, %c0_2, %c0_3, %c0_4] : memref<1x8x8x8xf32, #tpu.memory_space<vmem>>, vector<1x1x8x8xf32>
    %3 = vector.shape_cast %2 : vector<1x1x8x8xf32> to vector<8x8xf32>
    %c0_5 = arith.constant 0 : index
    %c0_6 = arith.constant 0 : index
    %4 = vector.load %arg5[%c0_5, %c0_6] : memref<64x64xf32, #tpu.memory_space<vmem>>, vector<8x8xf32>
    tpu.vector_store %arg5[%c0_5, %c0_6], %3 {strides = array<i32>} : memref<64x64xf32, #tpu.memory_space<vmem>>, vector<8x8xf32>,
    %c0_7 = arith.constant 0 : index
    %c1 = arith.constant 1 : index
    %c0_8 = arith.constant 0 : index
    %c0_9 = arith.constant 0 : index
    %5 = vector.load %arg1[%c0_7, %c1, %c0_8, %c0_9] : memref<1x8x8x8xf32, #tpu.memory_space<vmem>>, vector<1x1x8x8xf32>
    %6 = vector.shape_cast %5 : vector<1x1x8x8xf32> to vector<8x8xf32>
    %c8 = arith.constant 8 : index
    %c8_10 = arith.constant 8 : index
    %7 = vector.load %arg5[%c8, %c8_10] : memref<64x64xf32, #tpu.memory_space<vmem>>, vector<8x8xf32>
    tpu.vector_store %arg5[%c8, %c8_10], %6 {strides = array<i32>} : memref<64x64xf32, #tpu.memory_space<vmem>>, vector<8x8xf32>,
    %c0_11 = arith.constant 0 : index
    %c2 = arith.constant 2 : index
    %c0_12 = arith.constant 0 : index
    %c0_13 = arith.constant 0 : index
    %8 = vector.load %arg1[%c0_11, %c2, %c0_12, %c0_13] : memref<1x8x8x8xf32, #tpu.memory_space<vmem>>, vector<1x1x8x8xf32>
    %9 = vector.shape_cast %8 : vector<1x1x8x8xf32> to vector<8x8xf32>
    %c16 = arith.constant 16 : index
    %c16_14 = arith.constant 16 : index
    %10 = vector.load %arg5[%c16, %c16_14] : memref<64x64xf32, #tpu.memory_space<vmem>>, vector<8x8xf32>
    tpu.vector_store %arg5[%c16, %c16_14], %9 {strides = array<i32>} : memref<64x64xf32, #tpu.memory_space<vmem>>, vector<8x8xf32>,
    %c0_15 = arith.constant 0 : index
    %c3 = arith.constant 3 : index
    %c0_16 = arith.constant 0 : index
    %c0_17 = arith.constant 0 : index
    %11 = vector.load %arg1[%c0_15, %c3, %c0_16, %c0_17] : memref<1x8x8x8xf32, #tpu.memory_space<vmem>>, vector<1x1x8x8xf32>
    %12 = vector.shape_cast %11 : vector<1x1x8x8xf32> to vector<8x8xf32>
    %c24 = arith.constant 24 : index
    %c24_18 = arith.constant 24 : index
    %13 = vector.load %arg5[%c24, %c24_18] : memref<64x64xf32, #tpu.memory_space<vmem>>, vector<8x8xf32>
    tpu.vector_store %arg5[%c24, %c24_18], %12 {strides = array<i32>} : memref<64x64xf32, #tpu.memory_space<vmem>>, vector<8x8xf32>,
    %c0_19 = arith.constant 0 : index
    %c4 = arith.constant 4 : index
    %c0_20 = arith.constant 0 : index
    %c0_21 = arith.constant 0 : index
    %14 = vector.load %arg1[%c0_19, %c4, %c0_20, %c0_21] : memref<1x8x8x8xf32, #tpu.memory_space<vmem>>, vector<1x1x8x8xf32>
    %15 = vector.shape_cast %14 : vector<1x1x8x8xf32> to vector<8x8xf32>
    %c32 = arith.constant 32 : index
    %c32_22 = arith.constant 32 : index
    %16 = vector.load %arg5[%c32, %c32_22] : memref<64x64xf32, #tpu.memory_space<vmem>>, vector<8x8xf32>
    tpu.vector_store %arg5[%c32, %c32_22], %15 {strides = array<i32>} : memref<64x64xf32, #tpu.memory_space<vmem>>, vector<8x8xf32>,
    %c0_23 = arith.constant 0 : index
    %c5 = arith.constant 5 : index
    %c0_24 = arith.constant 0 : index
    %c0_25 = arith.constant 0 : index
    %17 = vector.load %arg1[%c0_23, %c5, %c0_24, %c0_25] : memref<1x8x8x8xf32, #tpu.memory_space<vmem>>, vector<1x1x8x8xf32>
    %18 = vector.shape_cast %17 : vector<1x1x8x8xf32> to vector<8x8xf32>
    %c40 = arith.constant 40 : index
    %c40_26 = arith.constant 40 : index
    %19 = vector.load %arg5[%c40, %c40_26] : memref<64x64xf32, #tpu.memory_space<vmem>>, vector<8x8xf32>
    tpu.vector_store %arg5[%c40, %c40_26], %18 {strides = array<i32>} : memref<64x64xf32, #tpu.memory_space<vmem>>, vector<8x8xf32>,
    %c0_27 = arith.constant 0 : index
    %c6 = arith.constant 6 : index
    %c0_28 = arith.constant 0 : index
    %c0_29 = arith.constant 0 : index
    %20 = vector.load %arg1[%c0_27, %c6, %c0_28, %c0_29] : memref<1x8x8x8xf32, #tpu.memory_space<vmem>>, vector<1x1x8x8xf32>
    %21 = vector.shape_cast %20 : vector<1x1x8x8xf32> to vector<8x8xf32>
    %c48 = arith.constant 48 : index
    %c48_30 = arith.constant 48 : index
    %22 = vector.load %arg5[%c48, %c48_30] : memref<64x64xf32, #tpu.memory_space<vmem>>, vector<8x8xf32>
    tpu.vector_store %arg5[%c48, %c48_30], %21 {strides = array<i32>} : memref<64x64xf32, #tpu.memory_space<vmem>>, vector<8x8xf32>,
    %c0_31 = arith.constant 0 : index
    %c7 = arith.constant 7 : index
    %c0_32 = arith.constant 0 : index
    %c0_33 = arith.constant 0 : index
    %23 = vector.load %arg1[%c0_31, %c7, %c0_32, %c0_33] : memref<1x8x8x8xf32, #tpu.memory_space<vmem>>, vector<1x1x8x8xf32>
    %24 = vector.shape_cast %23 : vector<1x1x8x8xf32> to vector<8x8xf32>
    %c56 = arith.constant 56 : index
    %c56_34 = arith.constant 56 : index
    %25 = vector.load %arg5[%c56, %c56_34] : memref<64x64xf32, #tpu.memory_space<vmem>>, vector<8x8xf32>
    tpu.vector_store %arg5[%c56, %c56_34], %24 {strides = array<i32>} : memref<64x64xf32, #tpu.memory_space<vmem>>, vector<8x8xf32>,
    %c0_35 = arith.constant 0 : index
    %c0_36 = arith.constant 0 : index
    %26 = vector.load %arg5[%c0_35, %c0_36] : memref<64x64xf32, #tpu.memory_space<vmem>>, vector<64x64xf32>
    %c0_37 = arith.constant 0 : index
    %c0_38 = arith.constant 0 : index
    %c0_39 = arith.constant 0 : index
    %27 = vector.load %arg2[%c0_37, %c0_38, %c0_39] : memref<1x64x128xf32, #tpu.memory_space<vmem>>, vector<1x64x128xf32>
    %28 = vector.shape_cast %27 : vector<1x64x128xf32> to vector<64x128xf32>
    %c0_40 = arith.constant 0 : index
    %c0_41 = arith.constant 0 : index
    %29 = vector.load %arg3[%c0_40, %c0_41] : memref<128x128xf32, #tpu.memory_space<vmem>>, vector<128x128xf32>
    %cst_42 = arith.constant dense<0.000000e+00> : vector<64x128xf32>
    %30 = tpu.matmul %26, %28, %cst_42 {dimension_numbers = #tpu.dot_dimension_numbers<[1], [0], [0], [1], [0, 0, 1, 1], [], []>} : vector<64x64xf32>, vector<64x128xf32>, vector<64x128xf32> -> vector<64x128xf32>
    %cst_43 = arith.constant dense<0.000000e+00> : vector<64x128xf32>
    %31 = tpu.matmul %30, %29, %cst_43 {dimension_numbers = #tpu.dot_dimension_numbers<[1], [0], [0], [1], [0, 0, 1, 1], [], []>} : vector<64x128xf32>, vector<128x128xf32>, vector<64x128xf32> -> vector<64x128xf32>
    %c0_44 = arith.constant 0 : index
    %c0_45 = arith.constant 0 : index
    %c0_46 = arith.constant 0 : index
    %32 = vector.load %arg4[%c0_44, %c0_45, %c0_46] : memref<1x64x128xf32, #tpu.memory_space<vmem>>, vector<1x64x128xf32>
    %33 = vector.shape_cast %32 : vector<1x64x128xf32> to vector<64x128xf32>
    %34 = vector.shape_cast %31 : vector<64x128xf32> to vector<1x64x128xf32>
    tpu.vector_store %arg4[%c0_44, %c0_45, %c0_46], %34 {strides = array<i32>} : memref<1x64x128xf32, #tpu.memory_space<vmem>>, vector<1x64x128xf32>,
    return
  }
  func.func @transform_0(%arg0: i32) -> (i32, i32, i32, i32) {
    %c0_i32 = arith.constant 0 : i32
    %c0_i32_0 = arith.constant 0 : i32
    %c0_i32_1 = arith.constant 0 : i32
    %c0_i32_2 = arith.constant 0 : i32
    return %arg0, %c0_i32, %c0_i32_0, %c0_i32_1 : i32, i32, i32, i32
  }
  func.func @transform_1(%arg0: i32) -> (i32, i32, i32) {
    %c0_i32 = arith.constant 0 : i32
    %c0_i32_0 = arith.constant 0 : i32
    %c0_i32_1 = arith.constant 0 : i32
    return %arg0, %c0_i32, %c0_i32_0 : i32, i32, i32
  }
  func.func @transform_2(%arg0: i32) -> (i32, i32) {
    %c0_i32 = arith.constant 0 : i32
    %c0_i32_0 = arith.constant 0 : i32
    %c0_i32_1 = arith.constant 0 : i32
    return %c0_i32, %c0_i32_0 : i32, i32
  }
  func.func @transform_3(%arg0: i32) -> (i32, i32, i32) {
    %c0_i32 = arith.constant 0 : i32
    %c0_i32_0 = arith.constant 0 : i32
    %c0_i32_1 = arith.constant 0 : i32
    return %arg0, %c0_i32, %c0_i32_0 : i32, i32, i32
  }
}

</mosaic_0001>

<bundles_post_ra>
// kernel: tpu_custom_call.1
= control target key start
LH: loop header
LB: loop body
LE: loop exit
PB: predicated region body
PF: predicated region fallthrough
CT: control target
= control target key end

     0   :  { %s1470_s0 = inlined_call_operand.hbm [shape: f32[2,8,8,8], index: 0, kind: input, shape index: {}]   ;;  %s1471_s1 = inlined_call_operand.hbm [shape: f32[2,64,128], index: 1, kind: input, shape index: {}]   ;;  %s1472_s2 = inlined_call_operand.hbm [shape: f32[128,128], index: 2, kind: input, shape index: {}]   ;;  %s1473_s3 = inlined_call_operand.hbm [shape: f32[2,64,128], index: 3, kind: output, shape index: {}]  }
   0x1   :  { %1481 = sst [smem:[#allocation14_spill]] %s1470_s0 }
   0x2   :  { %1482 = sst [smem:[#allocation15_spill]] %s1472_s2 }
   0x3   :  { %8 = vsyncpa [#allocation4], 0 }
   0x4   :  { %10 = vsyncpa [#allocation4 + $0x1], 0 }
   0x5   :  { %11 = vsyncpa [#allocation7], 0 }
   0x6   :  { %13 = vsyncpa [#allocation7 + $0x1], 0 }
   0x7   :  { %14 = vsyncpa [#allocation5], 0 }
   0x8   :  { %16 = vsyncpa [#allocation5 + $0x1], 0  ;;  %s1174_s12 = smov 0   ;;  %s1176_s13 = smov 0  }
   0x9   :  { %s1178_s14 = smov 0   ;;  %s1180_s15 = smov 0  }
   0xa LB: > { %s1195_s16 = sadd.s32 4294967295, %s1137_s15   ;;  %s704_s17 = sadd.s32 4294967294, %s1137_s15   ;;  %s1137_s15 = sphi %s1180_s15, %s1503_s15   ;;  %s1133_s14 = sphi %s1178_s14, %s1502_s14   ;;  %s1129_s13 = sphi %s1176_s13, %s1501_s13   ;;  %s1125_s12 = sphi %s1174_s12, %s1500_s12  }
   0xb   : > { %p42_p0 = scmp.ne.s32.totalorder %s1129_s13, %s1125_s12  ;;  %p1474_p1 = scmp.eq.s32.totalorder %s1195_s16, 0 }
   0xc   : > { %p119_p3 = scmp.eq.s32.totalorder %s704_s17, 1  ;;  %p705_p5 = scmp.ge.s32.totalorder %s1137_s15, 1 }
   0xd   : > { %p1204_p4 = por %p1474_p1, %p42_p0  ;;  %p126_p7 = scmp.lt.s32.totalorder %s1137_s15, 3 }
   0xe   : > { %p1209_p6 = por %p119_p3, %p42_p0  ;;  %s1139_s21 = smov [#allocation8]  }
   0xf   : > { %s1483_s18 = scalar_select %p1204_p4, 1, 0 }
  0x10   : > { %s1484_s19 = scalar_select %p1209_p6, 1, 0 }
  0x11   : > { %p1214_p8 = pnand %p705_p5, %p126_p7  ;;  %s138_s22 = sshll.u32 %s1139_s21, 4  ;;  %s1218_s22 = int_to_ptr.vmem [resolvable:$true] %s138_s22 }
  0x12   : > { %s1230_s24 = sadd.s32 1, %s1137_s15   ;;  %s29_s25 = sadd.s32 1, %s1133_s14 }
  0x13   : > { %s1485_s20 = scalar_select %p1214_p8, 1, 0 }
  0x14   : > { %p912_p9 = pneg %p1214_p8  ;;  %s26_s26 = ssub.s32 %s1137_s15, %s1230_s24 }
  0x15   : > { %s1487_s2 = sld [smem:[#allocation15_spill]] }
  0x16   : > { %p1225_p11 = pnand %p912_p9, %p1474_p1 }
  0x18   : > { %p977_p13 = pneg %p1225_p11 }
  0x1b   : > { %s975_s29 = scalar_lea.hbm %s1487_s2, 2048 }
  0x1c   : > { %p976_p12 = scmp.ne.s32.totalorder %s1487_s2, %s975_s29  ;;  %p982_p5 = scmp.lt.u32.totalorder %s975_s29, %s1487_s2 }
  0x1e   : > { %p978_p0 = pnand %p977_p13, %p976_p12 }
  0x20   : > { %p979_p3 = pneg %p978_p0 }
  0x22   : > { %p984_p7 = pnand %p982_p5, %p979_p3 }
  0x24   : > { %987 = shalt.err (!%p984_p7)
}
  0x25   : > { %s988_s7 = scalar_lea.vmem %s1218_s22, 2048  ;;  %p996_p2 = scmp.lt.s32.totalorder %s1218_s22, %s1218_s22 }
  0x26   : > { %p989_p9 = scmp.ne.s32.totalorder %s1218_s22, %s988_s7  ;;  %p997_p6 = scmp.lt.s32.totalorder %s988_s7, %s988_s7 }
  0x28   : > { %p991_p10 = pnand %p989_p9, %p977_p13  ;;  %p998_p4 = por %p997_p6, %p996_p2 }
  0x2a   : > { %p992_p1 = pneg %p991_p10 }
  0x2c   : > { %p999_p8 = pnand %p998_p4, %p992_p1 }
  0x2e   : > { %1002 = shalt.err (!%p999_p8)
}
  0x2f   : > { %s1477_s8 = smov 128   ;;  %s1479_s9 = smov 8  }
  0x30   : > { %915 = dma.hbm_to_vmem [thread:$0]  (!%p1225_p11), %s1487_s2, 2048, %s1218_s22, [#allocation7], %s1477_s8, %s1477_s8, %s1479_s9  }
  0x31   : > { %p27_p1 = scmp.eq.s32.totalorder %s26_s26, 0  ;;  %p36_p2 = scmp.ne.s32.totalorder %s1133_s14, %s1129_s13 }
  0x32   : > { %p37_p4 = scmp.eq.s32.totalorder %s1137_s15, 0  ;;  %p928_p6 = scmp.lt.s32.totalorder %s1137_s15, 2 }
  0x33   : > { %s1264_s17 = scalar_select %p27_p1, %s1133_s14, %s29_s25  }
  0x34   : > { %p38_p8 = por %p37_p4, %p36_p2  ;;  %p1488_p10 = scmp.eq.s32.totalorder %s1195_s16, 1 }
  0x35   : > { %s152_s23 = sand.u32 1, %s1133_s14   ;;  %s739_s27 = sshll.u32 %s1137_s15, 10 }
  0x36   : > { %p1268_p12 = por %p1488_p10, %p36_p2  ;;  %s1274_s28 = sshll.u32 %s152_s23, 6 }
  0x37   : > { %s1490_s0 = sld [smem:[#allocation14_spill]]  ;;  %s156_s25 = scalar_lea.vmem [#allocation3], %s1274_s28 }
  0x38   : > { %s163_s26 = sshll.u32 %s156_s25, 4  ;;  %p1282_p11 = pnand %p928_p6, %p38_p8  ;;  %s1286_s26 = int_to_ptr.vmem [resolvable:$true] %s163_s26 }
  0x39   : > { %s1291_s7 = scalar_lea.hbm %s1471_s1, %s739_s27  ;;  %s1293_s10 = scalar_lea.sflag [#allocation4], %s152_s23 }
  0x3a   : > { %p1005_p0 = pneg %p1282_p11 }
  0x3d   : > { %s1279_s22 = scalar_lea.hbm %s1490_s0, %s739_s27  ;;  %s1008_s25 = scalar_lea.hbm %s1490_s0, 2048 }
  0x3e   : > { %s1003_s11 = scalar_lea.hbm %s1279_s22, 1024  ;;  %p1009_p7 = scmp.lt.u32.totalorder %s1279_s22, %s1490_s0 }
  0x3f   : > { %p1004_p13 = scmp.ne.s32.totalorder %s1279_s22, %s1003_s11  ;;  %p1010_p9 = scmp.lt.u32.totalorder %s1008_s25, %s1003_s11 }
  0x40   : > { %p1012_p2 = scmp.lt.u32.totalorder %s1003_s11, %s1279_s22 }
  0x41   : > { %p1006_p3 = pnand %p1005_p0, %p1004_p13  ;;  %p1011_p1 = por %p1010_p9, %p1009_p7 }
  0x43   : > { %p1007_p5 = pneg %p1006_p3  ;;  %p1013_p4 = por %p1012_p2, %p1011_p1 }
  0x45   : > { %p1014_p6 = pnand %p1013_p4, %p1007_p5 }
  0x47   : > { %1017 = shalt.err (!%p1014_p6)
}
  0x48   : > { %s1018_s23 = scalar_lea.vmem %s1286_s26, 1024  ;;  %s1142_s27 = smov [#allocation3]  }
  0x49   : > { %p1019_p8 = scmp.ne.s32.totalorder %s1286_s26, %s1018_s23  ;;  %s1023_s5 = sshll.u32 %s1142_s27, 4  ;;  %s1024_s5 = int_to_ptr.vmem [resolvable:$false] %s1023_s5 }
  0x4a   : > { %s1025_s8 = scalar_lea.vmem %s1024_s5, 2048  ;;  %p1026_p3 = scmp.lt.s32.totalorder %s1286_s26, %s1024_s5 }
  0x4b   : > { %p1021_p10 = pnand %p1019_p8, %p1005_p0  ;;  %p1027_p7 = scmp.lt.s32.totalorder %s1025_s8, %s1018_s23 }
  0x4d   : > { %p1022_p13 = pneg %p1021_p10  ;;  %p1028_p9 = por %p1027_p7, %p1026_p3 }
  0x4f   : > { %p1029_p1 = pnand %p1028_p9, %p1022_p13 }
  0x51   : > { %1032 = shalt.err (!%p1029_p1)
}
  0x52   : > { %s1492_s9 = smov 8   ;;  %s1493_s6 = smov 128  }
  0x53   : > { %919 = dma.hbm_to_vmem [thread:$0]  (!%p1282_p11), %s1279_s22, 1024, %s1286_s26, %s1293_s10, %s1493_s6, %s1493_s6, %s1492_s9  }
  0x54   : > { %s177_s11 = scalar_lea.vmem [#allocation6], %s1274_s28  ;;  %s173_s30 = sand.u32 1, %s1137_s15  }
  0x55   : > { %s184_s29 = sshll.u32 %s177_s11, 4  ;;  %s1328_s25 = scalar_lea.sflag [#allocation7], %s173_s30  ;;  %s1326_s29 = int_to_ptr.vmem [resolvable:$true] %s184_s29 }
  0x56   : > { %s1033_s23 = scalar_lea.hbm %s1291_s7, 1024  ;;  %s1038_s8 = scalar_lea.hbm %s1471_s1, 2048 }
  0x57   : > { %p1034_p5 = scmp.ne.s32.totalorder %s1291_s7, %s1033_s23  ;;  %p1039_p6 = scmp.lt.u32.totalorder %s1291_s7, %s1471_s1 }
  0x58   : > { %p1040_p8 = scmp.lt.u32.totalorder %s1038_s8, %s1033_s23  ;;  %p1042_p13 = scmp.lt.u32.totalorder %s1033_s23, %s1291_s7 }
  0x59   : > { %p1036_p2 = pnand %p1034_p5, %p1005_p0 }
  0x5a   : > { %p1041_p10 = por %p1040_p8, %p1039_p6 }
  0x5b   : > { %p1037_p4 = pneg %p1036_p2 }
  0x5c   : > { %p1043_p3 = por %p1042_p13, %p1041_p10 }
  0x5e   : > { %p1044_p7 = pnand %p1043_p3, %p1037_p4 }
  0x60   : > { %1047 = shalt.err (!%p1044_p7)
}
  0x61   : > { %s1048_s28 = scalar_lea.vmem %s1326_s29, 1024  ;;  %s1143_s22 = smov [#allocation6]  }
  0x62   : > { %p1049_p9 = scmp.ne.s32.totalorder %s1326_s29, %s1048_s28  ;;  %s1053_s26 = sshll.u32 %s1143_s22, 4  ;;  %s1054_s26 = int_to_ptr.vmem [resolvable:$false] %s1053_s26 }
  0x63   : > { %s1055_s0 = scalar_lea.vmem %s1054_s26, 2048  ;;  %p1056_p2 = scmp.lt.s32.totalorder %s1326_s29, %s1054_s26 }
  0x64   : > { %p1051_p1 = pnand %p1049_p9, %p1005_p0  ;;  %p1057_p6 = scmp.lt.s32.totalorder %s1055_s0, %s1048_s28 }
  0x66   : > { %p1052_p5 = pneg %p1051_p1  ;;  %p1058_p8 = por %p1057_p6, %p1056_p2 }
  0x68   : > { %p1059_p10 = pnand %p1058_p8, %p1052_p5 }
  0x6a   : > { %1062 = shalt.err (!%p1059_p10)
}
  0x6b   : > { %922 = dma.hbm_to_vmem [thread:$0]  (!%p1282_p11), %s1291_s7, 1024, %s1326_s29, %s1328_s25, %s1493_s6, %s1493_s6, %s1492_s9  }
  0x6c   : > { %p1494_p0 = scmp.ne.s32.totalorder %s1485_s20, 0 }
  0x6d   : > { %s1360_s2 = sand.u32 (!%p1494_p0), 1, %s1129_s13   ;;  %p1495_p4 = scmp.ne.s32.totalorder (!%p1494_p0), %s1483_s18, 0 }
  0x6e   : > { %196 = sbr.rel (%p1494_p0) target bundleno = 703 (0x2bf), region = 32  ;;  %s1363_s10 = sshll.u32 (!%p1494_p0), %s1360_s2, 6 }
  0x6f   : > { %s199_s4 = scalar_lea.sflag (!%p1494_p0), [#allocation4], %s1360_s2  ;;  %s1367_s11 = scalar_lea.vmem (!%p1494_p0), [#allocation3], %s1363_s10 }
  0x75   : > { %1108 = dma.done.wait (%p1495_p4), %s199_s4, 1024  }
  0x76   : > { %1110 = vsyncadd (%p1495_p4), %s199_s4, 4294966272  ;;  %s207_s20 = sand.u32 1, %s1195_s16   ;;  %s1375_s9 = scalar_lea.vmem [#allocation6], %s1363_s10 }
  0x77   : > { %s208_s7 = scalar_lea.sflag [#allocation7], %s207_s20 }
  0x78   : > { %1112 = dma.done.wait (%p1495_p4), %s208_s7, 1024  }
  0x79   : > { %1114 = vsyncadd (%p1495_p4), %s208_s7, 4294966272  ;;  %p1496_p11 = scmp.eq.s32.totalorder %s1195_s16, 0 }
  0x7b   : > { %1116 = dma.done.wait (%p1496_p11), [#allocation7], 2048   ;;  %p1497_p13 = pmov %p1496_p11 }
  0x7c   : > { %vm243_vm0 = vcmask 523264   ;;  %v1144_v0 = vmov 0.0   ;;  %v719_v1 = vld [vmem:[%s1367_s11 + $0x8] sm:$0xff]  ;;  %v721_v2 = vld [vmem:[%s1367_s11 + $0x18] sm:$0xff]  ;;  %s1145_s18 = smov 8   ;;  %s1146_s6 = smov 24  }
  0x7d   : > { %1118 = vsyncadd (%p1497_p13), [#allocation7], 4294965248  ;;  %245 = vst.msk [vmem:[#allocation2 + $0x8] sm:$0xff] %vm243_vm0, %v1144_v0  ;;  %258 = vrot.lane.b32.xlu0 %v719_v1, %s1145_s18  ;;  %274 = vrot.lane.b32.xlu1 %v721_v2, %s1146_s6  ;;  %v720_v3 = vld [vmem:[%s1367_s11 + $0x10] sm:$0xff]  ;;  %v722_v4 = vld [vmem:[%s1367_s11 + $0x20] sm:$0xff]  ;;  %vm253_vm1 = vcmask 64512  }
  0x7e   : > { %244 = vst.msk [vmem:[#allocation2] sm:$0xff] %vm243_vm0, %v1144_v0  ;;  %246 = vst.msk [vmem:[#allocation2 + $0x10] sm:$0xff] %vm243_vm0, %v1144_v0  ;;  %v319_v5 = vld [vmem:[%s1375_s9] sm:$0xff]  ;;  %v320_v6 = vld [vmem:[%s1375_s9 + $0x8] sm:$0xff]  ;;  %s1147_s29 = smov 16   ;;  %s1148_s30 = smov 32  }
  0x7f   : > { %247 = vst.msk [vmem:[#allocation2 + $0x18] sm:$0xff] %vm243_vm0, %v1144_v0  ;;  %248 = vst.msk [vmem:[#allocation2 + $0x20] sm:$0xff] %vm243_vm0, %v1144_v0  ;;  %v321_v7 = vld [vmem:[%s1375_s9 + $0x10] sm:$0xff]  ;;  %v322_v8 = vld [vmem:[%s1375_s9 + $0x18] sm:$0xff]  ;;  %v854_v9 = vpack.c.bf16 %v320_v6, %v319_v5  ;;  %s1149_s25 = smov 40   ;;  %s1150_s23 = smov 48  }
  0x80   : > { %249 = vst.msk [vmem:[#allocation2 + $0x28] sm:$0xff] %vm243_vm0, %v1144_v0  ;;  %250 = vst.msk [vmem:[#allocation2 + $0x30] sm:$0xff] %vm243_vm0, %v1144_v0  ;;  %v858_v10 = vpack.c.bf16 %v322_v8, %v321_v7  ;;  %v323_v11 = vld [vmem:[%s1375_s9 + $0x20] sm:$0xff]  ;;  %v324_v12 = vld [vmem:[%s1375_s9 + $0x28] sm:$0xff]  ;;  %s1151_s27 = smov 56   ;;  %vm261_vm2 = vcmask 130112  }
  0x81   : > { %251 = vst.msk [vmem:[#allocation2 + $0x38] sm:$0xff] %vm243_vm0, %v1144_v0  ;;  %266 = vrot.lane.b32.xlu0 %v720_v3, %s1147_s29  ;;  %282 = vrot.lane.b32.xlu1 %v722_v4, %s1148_s30  ;;  %v252_v13 = vld [vmem:[%s1367_s11] sm:$0xff]  ;;  %v723_v14 = vld [vmem:[%s1367_s11 + $0x28] sm:$0xff]  ;;  %v862_v16 = vpack.c.bf16 %v324_v12, %v323_v11  ;;  %v329_v21 = vld [vmem:[#allocation8 + $0x10] sm:$0xff]  ;;  %vm277_vm3 = vcmask 261312   ;;  %vm269_vm4 = vcmask 195712  }
  0x82   : > { %v724_v15 = vld [vmem:[%s1367_s11 + $0x30] sm:$0xff]  ;;  %855 = vmatprep.subr.bf16.mxu0 %v854_v9  ;;  %254 = vst.msk [vmem:[#allocation2] sm:$0xff] %vm253_vm1, %v252_v13  ;;  %v326_v18 = vld [vmem:[%s1375_s9 + $0x38] sm:$0xff]  ;;  %v327_v19 = vld [vmem:[#allocation8] sm:$0xff]  ;;  %vm285_vm5 = vcmask 326912   ;;  %vm293_vm6 = vcmask 392512  }
  0x83   : > { %857 = vmatpush3.bf16.msra.mxu0 %v854_v9  ;;  %v325_v17 = vld [vmem:[%s1375_s9 + $0x30] sm:$0xff]  ;;  %v328_v20 = vld [vmem:[#allocation8 + $0x8] sm:$0xff]  ;;  %v725_v22 = vld [vmem:[%s1367_s11 + $0x38] sm:$0xff]  ;;  %vm301_vm7 = vcmask 458112   ;;  %vm309_vm8 = vcmask 523712   ;;  %s242_s5 = scalar_lea.vmem [#allocation9], %s1363_s10 }
  0x84   : > { %859 = vmatprep.subr.bf16.mxu0 %v858_v10  ;;  %v870_v23 = vpack.c.bf16 %v328_v20, %v327_v19  ;;  %v330_v24 = vld [vmem:[#allocation8 + $0x18] sm:$0xff]  ;;  %v331_v26 = vld [vmem:[#allocation8 + $0x20] sm:$0xff]  ;;  %v332_v27 = vld [vmem:[#allocation8 + $0x28] sm:$0xff]  ;;  %v866_v28 = vpack.c.bf16 %v326_v18, %v325_v17  ;;  %s599_s8 = sshll.u32 %s242_s5, 4  ;;  %s741_s28 = sshll.u32 %s1195_s16, 10  ;;  %s1420_s8 = int_to_ptr.vmem [resolvable:$true] %s599_s8 }
  0x85   : > { %290 = vrot.lane.b32.xlu0 %v723_v14, %s1149_s25  ;;  %298 = vrot.lane.b32.xlu1 %v724_v15, %s1150_s23  ;;  %v874_v25 = vpack.c.bf16 %v330_v24, %v329_v21  ;;  %v878_v30 = vpack.c.bf16 %v332_v27, %v331_v26  ;;  %v333_v31 = vld [vmem:[#allocation8 + $0x30] sm:$0xff]  ;;  %v334_v32 = vld [vmem:[#allocation8 + $0x38] sm:$0xff]  ;;  %v335_v34 = vld [vmem:[#allocation8 + $0x40] sm:$0xff]  ;;  %s1425_s0 = scalar_lea.hbm %s1473_s3, %s741_s28  ;;  %s586_s10 = scalar_lea.sflag [#allocation5], %s1360_s2 }
  0x86   : > { %871 = vmatprep.subr.bf16.mxu1 %v870_v23  ;;  %v882_v33 = vpack.c.bf16 %v334_v32, %v333_v31  ;;  %v336_v35 = vld [vmem:[#allocation8 + $0x48] sm:$0xff]  ;;  %v337_v37 = vld [vmem:[#allocation8 + $0x50] sm:$0xff]  ;;  %v338_v38 = vld [vmem:[#allocation8 + $0x58] sm:$0xff]  ;;  %s1063_s4 = scalar_lea.vmem %s1420_s8, 1024  ;;  %s1152_s16 = smov [#allocation9]  }
  0x87   : > { %861 = vmatpush3.bf16.msra.mxu0 %v858_v10  ;;  %873 = vmatpush3.bf16.msra.mxu1 %v870_v23  ;;  %v886_v36 = vpack.c.bf16 %v336_v35, %v335_v34  ;;  %v890_v39 = vpack.c.bf16 %v338_v38, %v337_v37  ;;  %v339_v40 = vld [vmem:[#allocation8 + $0x60] sm:$0xff]  ;;  %v340_v41 = vld [vmem:[#allocation8 + $0x68] sm:$0xff]  ;;  %v341_v43 = vld [vmem:[#allocation8 + $0x70] sm:$0xff]  ;;  %p1064_p3 = scmp.ne.s32.totalorder %s1420_s8, %s1063_s4  ;;  %s1067_s11 = sshll.u32 %s1152_s16, 4  ;;  %s1068_s11 = int_to_ptr.vmem [resolvable:$false] %s1067_s11 }
  0x88   : > { %863 = vmatprep.subr.bf16.mxu0 %v862_v16  ;;  %875 = vmatprep.subr.bf16.mxu1 %v874_v25  ;;  %v894_v42 = vpack.c.bf16 %v340_v41, %v339_v40  ;;  %v342_v44 = vld [vmem:[#allocation8 + $0x78] sm:$0xff]  ;;  %s1069_s20 = scalar_lea.vmem %s1068_s11, 2048  ;;  %p1070_p1 = scmp.lt.s32.totalorder %s1420_s8, %s1068_s11 }
  0x89   : > { %306 = vrot.lane.b32.xlu0 %v725_v22, %s1151_s27  ;;  %v311_v29 = vld [vmem:[#allocation2] sm:$0xff]  ;;  %v898_v45 = vpack.c.bf16 %v342_v44, %v341_v43  ;;  %p1065_p7 = pnand %p1064_p3, %p1268_p12  ;;  %p1071_p5 = scmp.lt.s32.totalorder %s1069_s20, %s1063_s4 }
  0x8a   : > { %798 = vmatprep.mubr.msk.f32.mxu0 %vm243_vm0, %v311_v29 }
  0x8b   : > { %865 = vmatpush3.bf16.msra.mxu0 %v862_v16  ;;  %877 = vmatpush3.bf16.msra.mxu1 %v874_v25  ;;  %p1066_p9 = pneg %p1065_p7  ;;  %p1072_p2 = por %p1071_p5, %p1070_p1 }
  0x8c   : > { %867 = vmatprep.subr.bf16.mxu0 %v866_v28  ;;  %879 = vmatprep.subr.bf16.mxu1 %v878_v30 }
  0x8d   : > { %p1073_p6 = pnand %p1072_p2, %p1066_p9 }
  0x8f   : > { %869 = vmatpush3.bf16.msra.mxu0 %v866_v28  ;;  %881 = vmatpush3.bf16.msra.mxu1 %v878_v30 }
  0x90   : > { %883 = vmatprep.subr.bf16.mxu1 %v882_v33 }
  0x93   : > { %885 = vmatpush3.bf16.msra.mxu1 %v882_v33 }
  0x94   : > { %887 = vmatprep.subr.bf16.mxu1 %v886_v36 }
  0x97   : > { %889 = vmatpush3.bf16.msra.mxu1 %v886_v36 }
  0x98   : > { %891 = vmatprep.subr.bf16.mxu1 %v890_v39 }
  0x9b   : > { %893 = vmatpush3.bf16.msra.mxu1 %v890_v39 }
  0x9c   : > { %895 = vmatprep.subr.bf16.mxu1 %v894_v42 }
  0x9f   : > { %897 = vmatpush3.bf16.msra.mxu1 %v894_v42 }
  0xa0   : > { %899 = vmatprep.subr.bf16.mxu1 %v898_v45 }
  0xa3   : > { %901 = vmatpush3.bf16.msra.mxu1 %v898_v45 }
  0xef   : > { %v259_v46 = vpop.permute.xlu0 %258  ;;  %v275_v47 = vpop.permute.xlu1 %274 }
  0xf0   : > { %262 = vst.msk [vmem:[#allocation2 + $0x8] sm:$0xff] %vm261_vm2, %v259_v46 }
  0xf1   : > { %278 = vst.msk [vmem:[#allocation2 + $0x18] sm:$0xff] %vm277_vm3, %v275_v47 }
  0xf3   : > { %v267_v48 = vpop.permute.xlu0 %266  ;;  %v283_v49 = vpop.permute.xlu1 %282 }
  0xf4   : > { %270 = vst.msk [vmem:[#allocation2 + $0x10] sm:$0xff] %vm269_vm4, %v267_v48 }
  0xf5   : > { %286 = vst.msk [vmem:[#allocation2 + $0x20] sm:$0xff] %vm285_vm5, %v283_v49 }
  0xf7   : > { %v291_v50 = vpop.permute.xlu0 %290  ;;  %v312_v51 = vld [vmem:[#allocation2 + $0x8] sm:$0xff]  ;;  %v299_v52 = vpop.permute.xlu1 %298 }
  0xf8   : > { %294 = vst.msk [vmem:[#allocation2 + $0x28] sm:$0xff] %vm293_vm6, %v291_v50  ;;  %799 = vmatmul.mubr.msk.f32.vlgmr.msra.gmra.mrb[0].mxu0 %vm243_vm0, %v312_v51  ;;  %v314_v53 = vld [vmem:[#allocation2 + $0x18] sm:$0xff] }
  0xf9   : > { %302 = vst.msk [vmem:[#allocation2 + $0x30] sm:$0xff] %vm301_vm7, %v299_v52 }
  0xfb   : > { %v307_v54 = vpop.permute.xlu0 %306  ;;  %v313_v55 = vld [vmem:[#allocation2 + $0x10] sm:$0xff] }
  0xfc   : > { %v315_v56 = vld [vmem:[#allocation2 + $0x20] sm:$0xff]  ;;  %310 = vst.msk [vmem:[#allocation2 + $0x38] sm:$0xff] %vm309_vm8, %v307_v54  ;;  %801 = vmatprep.mubr.msk.f32.mxu0 %vm243_vm0, %v313_v55 }
  0xfd   : > { %802 = vmatmul.mubr.msk.f32.gmra.mrb[2].mxu0 %vm243_vm0, %v314_v53 }
  0xfe   : > { %804 = vmatprep.mubr.msk.f32.mxu0 %vm243_vm0, %v315_v56 }
  0xff   : > { %v316_v57 = vld [vmem:[#allocation2 + $0x28] sm:$0xff] }
 0x100   : > { %v317_v58 = vld [vmem:[#allocation2 + $0x30] sm:$0xff] }
 0x101   : > { %805 = vmatmul.mubr.msk.f32.gmra.mrb[4].mxu0 %vm243_vm0, %v316_v57 }
 0x102   : > { %807 = vmatprep.mubr.msk.f32.mxu0 %vm243_vm0, %v317_v58 }
 0x103   : > { %v318_v59 = vld [vmem:[#allocation2 + $0x38] sm:$0xff] }
 0x105   : > { %808 = vmatmul.mubr.msk.f32.gmra.mrb[6].mxu0 %vm243_vm0, %v318_v59 }
 0x1cb   : > { %v800_v60 = vpop.f32.mrb[0].mxu0 }
 0x1cc   : > { %v433_v61 = vpop.f32.mrb[1].mxu0 }
 0x1cd   : > { %842 = vmatprep.mubr.f32.mxu1 %v433_v61 }
 0x1ce   : > { %843 = vmatmul.mubr.f32.vlgmr.msra.gmra.mrb[0].mxu1 %v800_v60 }
 0x1d0   : > { %v803_v62 = vpop.f32.mrb[2].mxu0 }
 0x1d1   : > { %v443_v63 = vpop.f32.mrb[3].mxu0 }
 0x1d2   : > { %845 = vmatprep.mubr.f32.mxu1 %v443_v63 }
 0x1d3   : > { %846 = vmatmul.mubr.f32.gmra.mrb[2].mxu1 %v803_v62 }
 0x1d4   : > { %v806_v0 = vpop.f32.mrb[4].mxu0 }
 0x1d5   : > { %v453_v1 = vpop.f32.mrb[5].mxu0 }
 0x1d6   : > { %848 = vmatprep.mubr.f32.mxu1 %v453_v1 }
 0x1d7   : > { %849 = vmatmul.mubr.f32.gmra.mrb[4].mxu1 %v806_v0 }
 0x1d8   : > { %v809_v2 = vpop.f32.mrb[6].mxu0 }
 0x1d9   : > { %v463_v3 = vpop.f32.mrb[7].mxu0 }
 0x1da   : > { %851 = vmatprep.mubr.f32.mxu1 %v463_v3 }
 0x1db   : > { %852 = vmatmul.mubr.f32.gmra.mrb[6].mxu1 %v809_v2 }
 0x2a1   : > { %v844_v4 = vpop.f32.mrb[0].mxu1 }
 0x2a2   : > { %578 = vst [vmem:[%s242_s5 + $0x8] sm:$0xff] %v844_v4  ;;  %v538_v5 = vpop.f32.mrb[1].mxu1 }
 0x2a3   : > { %577 = vst [vmem:[%s242_s5] sm:$0xff] %v538_v5 }
 0x2a6   : > { %v847_v6 = vpop.f32.mrb[2].mxu1 }
 0x2a7   : > { %580 = vst [vmem:[%s242_s5 + $0x18] sm:$0xff] %v847_v6  ;;  %v548_v7 = vpop.f32.mrb[3].mxu1 }
 0x2a8   : > { %579 = vst [vmem:[%s242_s5 + $0x10] sm:$0xff] %v548_v7 }
 0x2aa   : > { %v850_v8 = vpop.f32.mrb[4].mxu1 }
 0x2ab   : > { %582 = vst [vmem:[%s242_s5 + $0x28] sm:$0xff] %v850_v8  ;;  %v558_v9 = vpop.f32.mrb[5].mxu1 }
 0x2ac   : > { %581 = vst [vmem:[%s242_s5 + $0x20] sm:$0xff] %v558_v9 }
 0x2ae   : > { %v853_v10 = vpop.f32.mrb[6].mxu1 }
 0x2af   : > { %584 = vst [vmem:[%s242_s5 + $0x38] sm:$0xff] %v853_v10  ;;  %v568_v11 = vpop.f32.mrb[7].mxu1 }
 0x2b0   : > { %583 = vst [vmem:[%s242_s5 + $0x30] sm:$0xff] %v568_v11 }
 0x2b1   : > { %1076 = shalt.err (!%p1073_p6)
}
 0x2b2   : > { %s1077_s7 = scalar_lea.hbm %s1425_s0, 1024  ;;  %s1081_s29 = scalar_lea.hbm %s1473_s3, 2048 }
 0x2b3   : > { %p1078_p8 = scmp.ne.s32.totalorder %s1425_s0, %s1077_s7  ;;  %p1082_p4 = scmp.lt.u32.totalorder %s1425_s0, %s1473_s3 }
 0x2b4   : > { %p1083_p11 = scmp.lt.u32.totalorder %s1081_s29, %s1077_s7  ;;  %p1085_p3 = scmp.lt.u32.totalorder %s1077_s7, %s1425_s0 }
 0x2b5   : > { %p1079_p10 = pnand %p1078_p8, %p1268_p12 }
 0x2b6   : > { %p1084_p13 = por %p1083_p11, %p1082_p4 }
 0x2b7   : > { %p1080_p0 = pneg %p1079_p10 }
 0x2b8   : > { %p1086_p7 = por %p1085_p3, %p1084_p13 }
 0x2ba   : > { %p1087_p9 = pnand %p1086_p7, %p1080_p0 }
 0x2bc   : > { %1090 = shalt.err (!%p1087_p9)
}
 0x2bd   : > { %s1153_s23 = smov 128  }
 0x2be   : > { %910 = dma.vmem_to_hbm [thread:$0]  (%p1268_p12), %s1420_s8, 1024, %s1425_s0, %s586_s10, %s1153_s23, %s1153_s23, %s1145_s18  }
 0x2bf PF: > { %s614_s27 = sand.u32 1, %s1125_s12   ;;  %p1498_p1 = scmp.ne.s32.totalorder %s1484_s19, 0 }
 0x2c0   : > { %p1499_p5 = scmp.ge.s32.totalorder %s1137_s15, 2  ;;  %s615_s5 = scalar_lea.sflag [#allocation5], %s614_s27 }
 0x2c2   : > { %p924_p2 = pnand %p1499_p5, %p1498_p1 }
 0x2c4   : > { %1120 = dma.done.wait (!%p924_p2), %s615_s5, 1024  }
 0x2c5   : > { %1122 = vsyncadd (!%p924_p2), %s615_s5, 4294966272  ;;  %p19_p6 = scmp.ge.s32.totalorder %s1230_s24, 4   ;;  %s1500_s12 = smov %s1129_s13 }
 0x2c6   : > { %s1501_s13 = smov %s1133_s14  ;;  %s1502_s14 = smov %s1264_s17 }
 0x2c7   : > { %s1503_s15 = smov %s1230_s24  ;;  %21 = sbr.rel (!%p19_p6) target bundleno = 10 (0xa), region = 101 }
 0x2ce   :  { %620 = vsyncpa [#allocation4], 1 }
 0x2cf   :  { %622 = vsyncpa [#allocation4 + $0x1], 1 }
 0x2d0   :  { %623 = vsyncpa [#allocation7], 1 }
 0x2d1   :  { %625 = vsyncpa [#allocation7 + $0x1], 1 }
 0x2d2   :  { %626 = vsyncpa [#allocation5], 1 }
 0x2d3   :  { %628 = vsyncpa [#allocation5 + $0x1], 1 }

</bundles_post_ra>
